<compile_context>
chip_gen: v7x
topology: tpu7x:2x2x1
jax: 0.10.0
libtpu: 0.0.40
codegen_flags: <defaults>
</compile_context>

<pallas_src>
import functools

import jax
import jax.numpy as jnp
import numpy as np
from jax.experimental import pallas as pl
from jax.experimental.pallas import tpu as pltpu

_LANE = 128
_MIB = 1024 * 1024


def _device_kind():
    try:
        return jax.devices()[0].device_kind.lower()
    except Exception:
        return ""


def _tpu_params():
    """Returns (vmem_capacity_bytes, tensorcores_per_chip, has_bf16_vpu)."""
    kind = _device_kind()
    vmem = None
    try:
        vmem = int(pltpu.get_tpu_info().vmem_capacity_bytes)
    except Exception:
        vmem = None
    if vmem is None:
        vmem = 64 * _MIB if "v7" in kind else 128 * _MIB
    num_tc = 2 if "v7" in kind else 1
    bf16_vpu = ("v6" in kind) or ("v7" in kind)
    return vmem, num_tc, bf16_vpu


def _dice_rows_kernel(p_ref, t_ref, loss_ref, num_acc, den_acc, *,
                      smooth, power, spatial_size, spatial_tile, bf16_math):
    """Grid = (row_blocks, spatial_blocks); spatial axis is the reduction axis.

    p_ref / t_ref : (row_tile, spatial_tile) input blocks (auto-pipelined)
    loss_ref      : (row_tile, 1) per-row loss, written at the last spatial block
    num_acc/den_acc: (row_tile, 1) f32 VMEM accumulators (persist across grid)
    """
    k = pl.program_id(1)
    nk = pl.num_programs(1)

    @pl.when(k == 0)
    def _init():
        num_acc[...] = jnp.zeros_like(num_acc)
        den_acc[...] = jnp.zeros_like(den_acc)

    def _accumulate(mask_tail):
        p = p_ref[...]
        t = t_ref[...]
        if not bf16_math:
            # f32 path (f32 inputs; or bf16 inputs on chips without bf16 VPU).
            p = p.astype(jnp.float32)
            t = t.astype(jnp.float32)
        if mask_tail:
            # Ragged last spatial block only: zero out-of-range columns.
            col = jax.lax.broadcasted_iota(jnp.int32, p.shape, 1) + k * spatial_tile
            valid = col < spatial_size
            zero = jnp.zeros((), p.dtype)
            p = jnp.where(valid, p, zero)
            t = jnp.where(valid, t, zero)

        prod = p * t
        if power == 2:                      # VPU multiply, never exp(log(x))
            sq = p * p + t * t
        elif isinstance(power, int):
            sq = jax.lax.integer_pow(p, power) + jax.lax.integer_pow(t, power)
        else:
            sq = p ** power + t ** power    # TODO(synk): non-integer p uses EUP exp/log

        # Reduce / accumulate in f32 for accuracy (products may be bf16).
        num_acc[...] += jnp.sum(prod.astype(jnp.float32), axis=-1, keepdims=True)
        den_acc[...] += jnp.sum(sq.astype(jnp.float32), axis=-1, keepdims=True)

    if spatial_size % spatial_tile != 0:
        # Mask is only paid on the last (partial) spatial block.
        @pl.when(k < nk - 1)
        def _body():
            _accumulate(mask_tail=False)

        @pl.when(k == nk - 1)
        def _tail():
            _accumulate(mask_tail=True)
    else:
        _accumulate(mask_tail=False)

    @pl.when(k == nk - 1)
    def _finalize():
        num = num_acc[...] + smooth
        den = den_acc[...] + smooth
        loss_ref[...] = 1.0 - num / den


def _choose_tiles(num_rows, spatial, itemsize, *, vmem_cap, num_tc,
                  max_spatial_tile=None):
    # Rows per block: whole packing groups of the dtype (8 f32 / 16 bf16 /
    # 32 int8), capped at 64, or the full row dim (always legal).
    pack = {1: 32, 2: 16}.get(itemsize, 8)
    if num_rows <= pack:
        row_tile = num_rows
    else:
        row_tile = min(64, (num_rows // pack) * pack)
        # v7x: make sure the "parallel" row axis has >= 2 blocks so both
        # TensorCores get work (v5e/v6e are single-TC).
        if num_tc >= 2 and num_rows >= 2 * pack:
            half = max(pack, (((num_rows + 1) // 2) // pack) * pack)
            row_tile = min(row_tile, half)

    # Total tile footprint (2 inputs x 2 pipeline buffers), generation-aware:
    # ~32 MiB on 128 MiB-VMEM parts (v5e/v6e), ~16 MiB on v7x (64 MiB/TC).
    total_budget = min(vmem_cap // 4, 32 * _MIB)
    per_buffer = total_budget // 4
    max_ts = (per_buffer // max(row_tile * itemsize, 1)) // _LANE * _LANE
    max_ts = int(min(max(max_ts, _LANE), 32768))
    if max_spatial_tile is not None:
        max_ts = max(_LANE, min(max_ts, (max_spatial_tile // _LANE) * _LANE))

    if spatial <= max_ts:
        ts = spatial                         # full-dim block (always legal)
    else:
        # Prefer a lane-dense tile that divides S so no ragged mask is needed.
        ts = None
        cand = max_ts
        while cand >= _LANE:
            if spatial % cand == 0:
                ts = cand
                break
            cand -= _LANE
        if ts is None:
            ts = max_ts                      # ragged tail, masked in-kernel
    return row_tile, ts, total_budget


def dice_loss(predict, target, *, smooth=1.0, power=2, weight=None,
              ignore_index=None, max_spatial_tile=None):
    """Pallas implementation of DiceLoss(**kwargs).forward(predict, target)."""
    assert predict.shape == target.shape, "predict & target shape do not match"
    N, C = predict.shape[0], predict.shape[1]
    S = int(np.prod(predict.shape[2:])) if predict.ndim > 2 else 1
    NC = N * C

    # Lane-dense 2-D view: one row per (sample, class).
    pr = predict.reshape(NC, S)
    tg = target.reshape(NC, S)

    vmem_cap, num_tc, bf16_vpu = _tpu_params()
    itemsize = jnp.dtype(predict.dtype).itemsize
    # Native bf16 VPU math only where the hardware has it (v6e/v7x).
    bf16_math = bool(bf16_vpu and predict.dtype == jnp.bfloat16
                     and target.dtype == jnp.bfloat16)

    row_tile, ts, total_budget = _choose_tiles(
        NC, S, itemsize, vmem_cap=vmem_cap, num_tc=num_tc,
        max_spatial_tile=max_spatial_tile)
    grid = (pl.cdiv(NC, row_tile), pl.cdiv(S, ts))

    kernel = functools.partial(
        _dice_rows_kernel, smooth=float(smooth), power=power,
        spatial_size=S, spatial_tile=ts, bf16_math=bf16_math)

    cost = pl.CostEstimate(
        flops=5 * NC * S,
        transcendentals=0,
        bytes_accessed=(pr.size + tg.size) * itemsize + NC * 4)

    vmem_limit = int(min(total_budget + 16 * _MIB, (vmem_cap * 3) // 4))

    per_row_loss = pl.pallas_call(
        kernel,
        out_shape=jax.ShapeDtypeStruct((NC, 1), jnp.float32),
        grid_spec=pltpu.PrefetchScalarGridSpec(
            num_scalar_prefetch=0,
            grid=grid,
            in_specs=[
                pl.BlockSpec((row_tile, ts), lambda i, k: (i, k)),
                pl.BlockSpec((row_tile, ts), lambda i, k: (i, k)),
            ],
            out_specs=pl.BlockSpec((row_tile, 1), lambda i, k: (i, 0)),
            scratch_shapes=[
                pltpu.VMEM((row_tile, 1), jnp.float32),
                pltpu.VMEM((row_tile, 1), jnp.float32),
            ],
        ),
        compiler_params=pltpu.CompilerParams(
            dimension_semantics=("parallel", "arbitrary"),
            vmem_limit_bytes=vmem_limit),
        cost_estimate=cost,
    )(pr, tg)

    # BinaryDiceLoss(reduction='mean') over the batch per class; weight /
    # ignore_index applied per class, summed over classes and divided by C
    # (tiny epilogue, plain JAX).
    per_class = jnp.mean(per_row_loss.reshape(N, C), axis=0)    # (C,)
    if weight is not None:
        per_class = per_class * jnp.asarray(weight, jnp.float32)
    if ignore_index is not None:
        per_class = per_class.at[ignore_index].set(0.0)
    return jnp.sum(per_class) / C


def _dice_loss_ref(predict, target, smooth=1.0, power=2):
    """Plain-JAX reference mirroring the PyTorch module (defaults)."""
    N, C = predict.shape[0], predict.shape[1]
    pr = predict.reshape(N, C, -1).astype(jnp.float32)
    tg = target.reshape(N, C, -1).astype(jnp.float32)
    total = 0.0
    for i in range(C):
        num = jnp.sum(pr[:, i] * tg[:, i], axis=1) + smooth
        den = jnp.sum(pr[:, i] ** power + tg[:, i] ** power, axis=1) + smooth
        total = total + jnp.mean(1.0 - num / den)
    return total / C


if __name__ == "__main__":
    key = jax.random.PRNGKey(0)
    k1, k2, k3, k4 = jax.random.split(key, 4)

    # --- main case: (N, C, H, W) probabilities vs one-hot targets, f32 ------
    N, C, H, W = 2, 4, 16, 16
    logits = jax.random.normal(k1, (N, C, H, W), dtype=jnp.float32)
    predict = jax.nn.softmax(logits, axis=1)
    labels = jax.random.randint(k2, (N, H, W), 0, C)
    target = jax.nn.one_hot(labels, C, axis=1, dtype=jnp.float32)  # (N,C,H,W)

    loss = jax.block_until_ready(dice_loss(predict, target, smooth=1.0, power=2))
    ref = _dice_loss_ref(predict, target, smooth=1.0, power=2)
    np.testing.assert_allclose(np.asarray(loss), np.asarray(ref),
                               rtol=1e-5, atol=1e-5)

    # --- ragged spatial tail: force a small spatial tile so the masked
    #     last-block path is exercised ---------------------------------------
    S2 = 300
    logits2 = jax.random.normal(k3, (2, 4, S2), dtype=jnp.float32)
    predict2 = jax.nn.softmax(logits2, axis=1)
    labels2 = jax.random.randint(k4, (2, S2), 0, 4)
    target2 = jax.nn.one_hot(labels2, 4, axis=1, dtype=jnp.float32)
    loss2 = jax.block_until_ready(
        dice_loss(predict2, target2, smooth=1.0, power=2, max_spatial_tile=128))
    ref2 = _dice_loss_ref(predict2, target2, smooth=1.0, power=2)
    np.testing.assert_allclose(np.asarray(loss2), np.asarray(ref2),
                               rtol=1e-5, atol=1e-5)

    # --- bf16 inputs (native bf16 VPU math on v6e/v7x, f32 path elsewhere) --
    predict3 = predict.astype(jnp.bfloat16)
    target3 = target.astype(jnp.bfloat16)
    loss3 = jax.block_until_ready(dice_loss(predict3, target3))
    ref3 = _dice_loss_ref(predict3.astype(jnp.float32),
                          target3.astype(jnp.float32))
    np.testing.assert_allclose(np.asarray(loss3), np.asarray(ref3),
                               rtol=2e-2, atol=2e-2)

    print("KERNEL_OK")
</pallas_src>

<mosaic_0001>
module attributes {stable_mosaic.version = 11 : i64} {
  func.func @_dice_rows_kernel(%arg0: i32, %arg1: i32, %arg2: memref<8x256xf32, #tpu.memory_space<vmem>>, %arg3: memref<8x256xf32, #tpu.memory_space<vmem>>, %arg4: memref<8x1xf32, #tpu.memory_space<vmem>>, %arg5: memref<8x1xf32, #tpu.memory_space<vmem>>, %arg6: memref<8x1xf32, #tpu.memory_space<vmem>>) attributes {dimension_semantics = [#tpu.dimension_semantics<parallel>, #tpu.dimension_semantics<arbitrary>], iteration_bounds = array<i64: 1, 1>, scalar_prefetch = 0 : i64, scratch_operands = 2 : i64, tpu.core_type = #tpu.core_type<tc>, window_params = [{transform_indices = @transform_0, window_bounds = array<i64: 8, 256>}, {transform_indices = @transform_1, window_bounds = array<i64: 8, 256>}, {transform_indices = @transform_2, window_bounds = array<i64: 8, 1>}]} {
    %c0_i32 = arith.constant 0 : i32
    %0 = arith.cmpi eq, %arg1, %c0_i32 : i32
    %1 = arith.extui %0 : i1 to i32
    %c0_i32_0 = arith.constant 0 : i32
    %2 = arith.cmpi ne, %1, %c0_i32_0 : i32
    scf.if %2 {
      %cst_15 = arith.constant 0.000000e+00 : f32
      %22 = vector.broadcast %cst_15 : f32 to vector<8x1xf32>
      %c0_16 = arith.constant 0 : index
      %c0_17 = arith.constant 0 : index
      %23 = vector.load %arg5[%c0_16, %c0_17] : memref<8x1xf32, #tpu.memory_space<vmem>>, vector<8x1xf32>
      tpu.vector_store %arg5[%c0_16, %c0_17], %22 {strides = array<i32>} : memref<8x1xf32, #tpu.memory_space<vmem>>, vector<8x1xf32>,
      %cst_18 = arith.constant 0.000000e+00 : f32
      %24 = vector.broadcast %cst_18 : f32 to vector<8x1xf32>
      %c0_19 = arith.constant 0 : index
      %c0_20 = arith.constant 0 : index
      %25 = vector.load %arg6[%c0_19, %c0_20] : memref<8x1xf32, #tpu.memory_space<vmem>>, vector<8x1xf32>
      tpu.vector_store %arg6[%c0_19, %c0_20], %24 {strides = array<i32>} : memref<8x1xf32, #tpu.memory_space<vmem>>, vector<8x1xf32>,
    } else {
    }
    %c0 = arith.constant 0 : index
    %c0_1 = arith.constant 0 : index
    %3 = vector.load %arg2[%c0, %c0_1] : memref<8x256xf32, #tpu.memory_space<vmem>>, vector<8x256xf32>
    %c0_2 = arith.constant 0 : index
    %c0_3 = arith.constant 0 : index
    %4 = vector.load %arg3[%c0_2, %c0_3] : memref<8x256xf32, #tpu.memory_space<vmem>>, vector<8x256xf32>
    %5 = arith.mulf %3, %4 : vector<8x256xf32>
    %6 = arith.mulf %3, %3 : vector<8x256xf32>
    %7 = arith.mulf %4, %4 : vector<8x256xf32>
    %8 = arith.addf %6, %7 : vector<8x256xf32>
    %c0_4 = arith.constant 0 : index
    %c0_5 = arith.constant 0 : index
    %9 = vector.load %arg5[%c0_4, %c0_5] : memref<8x1xf32, #tpu.memory_space<vmem>>, vector<8x1xf32>
    %cst = arith.constant dense<0.000000e+00> : vector<8xf32>
    %10 = vector.multi_reduction <add>, %5, %cst [1] : vector<8x256xf32> to vector<8xf32>
    %11 = vector.shape_cast %10 : vector<8xf32> to vector<8x1xf32>
    %12 = arith.addf %9, %11 : vector<8x1xf32>
    %c0_6 = arith.constant 0 : index
    %c0_7 = arith.constant 0 : index
    %13 = vector.load %arg5[%c0_6, %c0_7] : memref<8x1xf32, #tpu.memory_space<vmem>>, vector<8x1xf32>
    tpu.vector_store %arg5[%c0_6, %c0_7], %12 {strides = array<i32>} : memref<8x1xf32, #tpu.memory_space<vmem>>, vector<8x1xf32>,
    %c0_8 = arith.constant 0 : index
    %c0_9 = arith.constant 0 : index
    %14 = vector.load %arg6[%c0_8, %c0_9] : memref<8x1xf32, #tpu.memory_space<vmem>>, vector<8x1xf32>
    %cst_10 = arith.constant dense<0.000000e+00> : vector<8xf32>
    %15 = vector.multi_reduction <add>, %8, %cst_10 [1] : vector<8x256xf32> to vector<8xf32>
    %16 = vector.shape_cast %15 : vector<8xf32> to vector<8x1xf32>
    %17 = arith.addf %14, %16 : vector<8x1xf32>
    %c0_11 = arith.constant 0 : index
    %c0_12 = arith.constant 0 : index
    %18 = vector.load %arg6[%c0_11, %c0_12] : memref<8x1xf32, #tpu.memory_space<vmem>>, vector<8x1xf32>
    tpu.vector_store %arg6[%c0_11, %c0_12], %17 {strides = array<i32>} : memref<8x1xf32, #tpu.memory_space<vmem>>, vector<8x1xf32>,
    %c0_i32_13 = arith.constant 0 : i32
    %19 = arith.cmpi eq, %arg1, %c0_i32_13 : i32
    %20 = arith.extui %19 : i1 to i32
    %c0_i32_14 = arith.constant 0 : i32
    %21 = arith.cmpi ne, %20, %c0_i32_14 : i32
    scf.if %21 {
      %c0_15 = arith.constant 0 : index
      %c0_16 = arith.constant 0 : index
      %22 = vector.load %arg5[%c0_15, %c0_16] : memref<8x1xf32, #tpu.memory_space<vmem>>, vector<8x1xf32>
      %cst_17 = arith.constant 1.000000e+00 : f32
      %23 = vector.broadcast %cst_17 : f32 to vector<8x1xf32>
      %24 = arith.addf %22, %23 : vector<8x1xf32>
      %c0_18 = arith.constant 0 : index
      %c0_19 = arith.constant 0 : index
      %25 = vector.load %arg6[%c0_18, %c0_19] : memref<8x1xf32, #tpu.memory_space<vmem>>, vector<8x1xf32>
      %cst_20 = arith.constant 1.000000e+00 : f32
      %26 = vector.broadcast %cst_20 : f32 to vector<8x1xf32>
      %27 = arith.addf %25, %26 : vector<8x1xf32>
      %28 = arith.divf %24, %27 : vector<8x1xf32>
      %cst_21 = arith.constant 1.000000e+00 : f32
      %29 = vector.broadcast %cst_21 : f32 to vector<8x1xf32>
      %30 = arith.subf %29, %28 : vector<8x1xf32>
      %c0_22 = arith.constant 0 : index
      %c0_23 = arith.constant 0 : index
      %31 = vector.load %arg4[%c0_22, %c0_23] : memref<8x1xf32, #tpu.memory_space<vmem>>, vector<8x1xf32>
      tpu.vector_store %arg4[%c0_22, %c0_23], %30 {strides = array<i32>} : memref<8x1xf32, #tpu.memory_space<vmem>>, vector<8x1xf32>,
    } else {
    }
    return
  }
  func.func @transform_0(%arg0: i32, %arg1: i32) -> (i32, i32) {
    %c0_i32 = arith.constant 0 : i32
    return %arg0, %arg1 : i32, i32
  }
  func.func @transform_1(%arg0: i32, %arg1: i32) -> (i32, i32) {
    %c0_i32 = arith.constant 0 : i32
    return %arg0, %arg1 : i32, i32
  }
  func.func @transform_2(%arg0: i32, %arg1: i32) -> (i32, i32) {
    %c0_i32 = arith.constant 0 : i32
    %c0_i32_0 = arith.constant 0 : i32
    return %arg0, %c0_i32 : i32, i32
  }
}

</mosaic_0001>

<bundles_post_ra>
// kernel: tpu_custom_call.1
= control target key start
LH: loop header
LB: loop body
LE: loop exit
PB: predicated region body
PF: predicated region fallthrough
CT: control target
= control target key end

     0   :  { %7 = vsyncpa [#allocation5], 0  ;;  %s187_s0 = inlined_call_operand.hbm [shape: f32[8,256], index: 0, kind: input, shape index: {}]   ;;  %s188_s1 = inlined_call_operand.hbm [shape: f32[8,256], index: 1, kind: input, shape index: {}]   ;;  %s189_s2 = inlined_call_operand.vmem [shape: f32[8,1], index: 2, kind: output, shape index: {}]  }
   0x1   :  { %8 = vsyncpa [#allocation7], 0  ;;  %s137_s9 = smov [#allocation4]   ;;  %s138_s11 = smov [#allocation6]  }
   0x2   :  { %s15_s10 = sshll.u32 %s137_s9, 4  ;;  %s25_s12 = sshll.u32 %s138_s11, 4  ;;  %s16_s10 = int_to_ptr.vmem [resolvable:$true] %s15_s10  ;;  %s26_s12 = int_to_ptr.vmem [resolvable:$true] %s25_s12 }
   0x3   :  { %s89_s15 = scalar_lea.hbm %s187_s0, 256 }
   0x4   :  { %p90_p0 = scmp.ne.s32.totalorder %s187_s0, %s89_s15  ;;  %p93_p1 = scmp.lt.u32.totalorder %s89_s15, %s187_s0 }
   0x6   :  { %p95_p2 = pnand %p93_p1, %p90_p0 }
   0x8   :  { %98 = shalt.err (!%p95_p2)
}
   0x9   :  { %s99_s20 = scalar_lea.vmem %s16_s10, 256  ;;  %p104_p4 = scmp.lt.s32.totalorder %s16_s10, %s16_s10 }
   0xa   :  { %p100_p3 = scmp.ne.s32.totalorder %s16_s10, %s99_s20  ;;  %p105_p5 = scmp.lt.s32.totalorder %s99_s20, %s99_s20 }
   0xc   :  { %p106_p6 = por %p105_p5, %p104_p4 }
   0xe   :  { %p107_p7 = pnand %p106_p6, %p100_p3 }
  0x10   :  { %110 = shalt.err (!%p107_p7)
}
  0x11   :  { %18 = dma.hbm_to_vmem [thread:$0]  %s187_s0, 256, %s16_s10, [#allocation5]  }
  0x12   :  { %s111_s25 = scalar_lea.hbm %s188_s1, 256 }
  0x13   :  { %p112_p8 = scmp.ne.s32.totalorder %s188_s1, %s111_s25  ;;  %p115_p9 = scmp.lt.u32.totalorder %s111_s25, %s188_s1 }
  0x15   :  { %p117_p10 = pnand %p115_p9, %p112_p8 }
  0x17   :  { %120 = shalt.err (!%p117_p10)
}
  0x18   :  { %s121_s30 = scalar_lea.vmem %s26_s12, 256  ;;  %p126_p12 = scmp.lt.s32.totalorder %s26_s12, %s26_s12 }
  0x19   :  { %p122_p11 = scmp.ne.s32.totalorder %s26_s12, %s121_s30  ;;  %p127_p13 = scmp.lt.s32.totalorder %s121_s30, %s121_s30 }
  0x1b   :  { %p128_p0 = por %p127_p13, %p126_p12 }
  0x1d   :  { %p129_p1 = pnand %p128_p0, %p122_p11 }
  0x1f   :  { %132 = shalt.err (!%p129_p1)
}
  0x20   :  { %28 = dma.hbm_to_vmem [thread:$0]  %s188_s1, 256, %s26_s12, [#allocation7]  }
  0x21   :  { %133 = dma.done.wait [#allocation5], 256  }
  0x22   :  { %134 = vsyncadd [#allocation5], 4294967040 }
  0x23   :  { %135 = dma.done.wait [#allocation7], 256  }
  0x24   :  { %136 = vsyncadd [#allocation7], 4294967040  ;;  %vm39_vm0 = vcmask 7168   ;;  %v139_v0 = vmov 0.0   ;;  %v42_v1 = vld [vmem:[#allocation4] sm:$0xff]  ;;  %v43_v2 = vld [vmem:[#allocation4 + $0x8] sm:$0xff] }
  0x25   :  { %41 = vst.msk [vmem:[#allocation3] sm:$0xff] %vm39_vm0, %v139_v0  ;;  %40 = vst.msk [vmem:[#allocation2] sm:$0xff] %vm39_vm0, %v139_v0  ;;  %v44_v3 = vld [vmem:[#allocation6] sm:$0xff]  ;;  %v45_v4 = vld [vmem:[#allocation6 + $0x8] sm:$0xff]  ;;  %v48_v5 = vmul.f32 %v42_v1, %v42_v1  ;;  %v49_v6 = vmul.f32 %v43_v2, %v43_v2 }
  0x26   :  { %v50_v7 = vmul.f32 %v44_v3, %v44_v3  ;;  %v51_v8 = vmul.f32 %v45_v4, %v45_v4  ;;  %v46_v11 = vmul.f32 %v44_v3, %v42_v1  ;;  %v47_v12 = vmul.f32 %v45_v4, %v43_v2 }
  0x28   :  { %v52_v9 = vadd.f32 %v50_v7, %v48_v5  ;;  %v53_v10 = vadd.f32 %v51_v8, %v49_v6  ;;  %v55_v14 = vadd.f32 %v47_v12, %v46_v11 }
  0x2a   :  { %v62_v13 = vadd.f32 %v53_v10, %v52_v9 }
  0x2c   :  { %63 = vadd.xlane.f32.xlu0 %v62_v13  ;;  %v61_v15 = vld [vmem:[#allocation3] sm:$0xff]  ;;  %v54_v18 = vld [vmem:[#allocation2] sm:$0xff] }
  0x30   :  { %56 = vadd.xlane.f32.xlu0 %v55_v14 }
  0xb9   :  { %v64_v16 = vpop.xlane.xlu0 %63 }
  0xba   :  { %v65_v17 = vadd.f32 %v64_v16, %v61_v15 }
  0xbc   :  { %66 = vst.msk [vmem:[#allocation3] sm:$0xff] %vm39_vm0, %v65_v17 }
  0xbd   :  { %v57_v19 = vpop.xlane.xlu0 %56 }
  0xbe   :  { %v58_v20 = vadd.f32 %v57_v19, %v54_v18 }
  0xc0   :  { %60 = vst.msk [vmem:[#allocation2] sm:$0xff] %vm39_vm0, %v58_v20 }
  0xc3   :  { %v72_v21 = vld [vmem:[#allocation3] sm:$0xff] }
  0xc4   :  { %v73_v22 = vadd.f32 1.0, %v72_v21 }
  0xc6   :  { %87 = vrcp.f32 %v73_v22 }
  0xc7   :  { %v70_v23 = vld [vmem:[#allocation2] sm:$0xff] }
  0xc8   :  { %v71_v24 = vadd.f32 1.0, %v70_v23 }
  0xd0   :  { %v88_v25 = vpop.eup %87 }
  0xd1   :  { %v75_v26 = vmul.f32 %v88_v25, %v71_v24 }
  0xd3   :  { %v76_v27 = vsub.f32 1.0, %v75_v26 }
  0xd5   :  { %77 = vst.msk [vmem:[%s189_s2] sm:$0xff] %vm39_vm0, %v76_v27 }
  0xd6   :  { %82 = vsyncpa [#allocation5], 1 }
  0xd7   :  { %83 = vsyncpa [#allocation7], 1 }

</bundles_post_ra>
